<compile_context>
chip_gen: v6e
topology: v6e:2x2x1
jax: 0.10.0
libtpu: 0.0.40
codegen_flags: <defaults>
</compile_context>

<pallas_src>
import functools

import jax
import jax.numpy as jnp
from jax import lax
from jax.experimental import pallas as pl
from jax.experimental.pallas import tpu as pltpu

# ----- module "parameters" (deterministic, from __init__ defaults) -----------
ALPHA = 0.25
GAMMA = 2.0
LABEL_SMOOTHING = 0.0
REDUCTION = "mean"

_LANES = 128
_SUBLANES = 8
_MAX_BLOCK_ROWS = 4096   # (4096,128) f32 = 2 MiB / block; fits all generations
_CHUNK_ROWS = 512        # in-kernel sub-chunk: bounds elementwise temporaries


def _num_tensorcores() -> int:
    """Best-effort TensorCore count (v7x: 2; v5e/v6e: 1).  Defaults to 1."""
    try:
        info = pltpu.get_tpu_info()
    except Exception:
        return 1
    for name in ("num_cores", "core_count", "num_tensorcores",
                 "tensorcore_count", "cores_per_chip", "num_cores_per_chip"):
        v = getattr(info, name, None)
        if isinstance(v, int) and v > 0:
            return min(v, 2)          # only 1- and 2-TC chips exist today
    return 1


def _focal_loss_kernel(x_ref, t_ref, out_ref, *,
                       alpha, gamma, pos_smooth, neg_smooth, use_smoothing,
                       binary_fast, approx_recip, n_valid, block_rows,
                       chunk_rows, tiles_per_core, need_mask, two_axes):
    if two_axes:
        i = pl.program_id(1)                          # inner ("arbitrary") axis
        blk = pl.program_id(0) * tiles_per_core + i   # global block index
    else:
        i = pl.program_id(0)
        blk = i

    # out_ref is this core's (8,128) VMEM accumulator; it stays resident across
    # the inner axis and is written back to HBM once.
    @pl.when(i == 0)
    def _():
        out_ref[...] = jnp.zeros_like(out_ref)

    block_base = blk * (block_rows * _LANES)   # flat index of this block's elem 0
    n_chunks = block_rows // chunk_rows

    def loss_tile(x, t):
        if use_smoothing:
            t = jnp.where(t > 0.5, jnp.float32(pos_smooth), jnp.float32(neg_smooth))
        e = jnp.exp(-jnp.abs(x))                              # EUP op #1
        bce = jnp.maximum(x, 0.0) - x * t + jnp.log1p(e)      # EUP op #2
        if binary_fast:
            # For binary t, pt = exp(-bce) == sigmoid(x) if t==1 else sigmoid(-x).
            # Reuse e plus a near-free EUP reciprocal instead of a 3rd exp.
            inv = pl.reciprocal(1.0 + e, approx=approx_recip)
            agree = jnp.logical_xor(x < 0.0, t > 0.5)   # logit sign matches target
            pt = jnp.where(agree, inv, e * inv)
        else:
            pt = jnp.exp(-bce)                                # exact path
        alpha_w = jnp.where(t > jnp.float32(neg_smooth),
                            jnp.float32(alpha), jnp.float32(1.0 - alpha))
        if gamma == 2.0:
            d = 1.0 - pt
            focal = d * d          # explicit square: no float-pow on the EUP
        else:
            focal = jnp.maximum(1.0 - pt, 0.0) ** gamma
        return alpha_w * focal * bce

    def chunk_body(off, apply_mask):
        x = x_ref[pl.ds(off, chunk_rows), :].astype(jnp.float32)
        t = t_ref[pl.ds(off, chunk_rows), :].astype(jnp.float32)
        f = loss_tile(x, t)
        if apply_mask:
            ridx = lax.broadcasted_iota(jnp.int32, f.shape, 0)
            lidx = lax.broadcasted_iota(jnp.int32, f.shape, 1)
            gidx = block_base + (off + ridx) * _LANES + lidx
            f = jnp.where(gidx < n_valid, f, 0.0)
        # chunk_rows -> 8 sublanes with pure VPU adds; the final cross-lane
        # reduce happens once in XLA on the tiny partials array.
        out_ref[...] += jnp.sum(f.reshape(-1, _SUBLANES, _LANES), axis=0)

    def accumulate(apply_mask):
        if n_chunks == 1:
            chunk_body(0, apply_mask)
        else:
            @pl.loop(0, n_chunks)
            def _(c):
                chunk_body(pl.multiple_of(c * chunk_rows, chunk_rows), apply_mask)

    if need_mask:
        # Only the block(s) straddling n_valid (plus duplicated overrun blocks,
        # whose unclamped indices are all >= n_valid) pay for the tail mask.
        straddles = block_base + block_rows * _LANES > n_valid

        @pl.when(straddles)
        def _():
            accumulate(True)

        @pl.when(jnp.logical_not(straddles))
        def _():
            accumulate(False)
    else:
        accumulate(False)


def _run_pallas(x2d, t2d, *, n, block_rows, n_cores, alpha, gamma,
                label_smoothing, binary_fast, approx_recip):
    rows = x2d.shape[0]
    num_blocks = int(pl.cdiv(rows, block_rows))
    n_cores = max(1, min(int(n_cores), num_blocks))
    two_axes = n_cores >= 2
    tiles_per_core = int(pl.cdiv(num_blocks, n_cores))
    covered = n_cores * tiles_per_core * block_rows * _LANES
    need_mask = covered > n
    overrun = n_cores * tiles_per_core > num_blocks

    chunk_rows = _CHUNK_ROWS if block_rows % _CHUNK_ROWS == 0 else block_rows

    if label_smoothing > 0:
        pos_smooth = 1.0 - label_smoothing / 2.0
        neg_smooth = label_smoothing / 2.0
    else:
        pos_smooth, neg_smooth = 1.0, 0.0

    kernel = functools.partial(
        _focal_loss_kernel,
        alpha=float(alpha), gamma=float(gamma),
        pos_smooth=float(pos_smooth), neg_smooth=float(neg_smooth),
        use_smoothing=label_smoothing > 0,
        binary_fast=bool(binary_fast), approx_recip=bool(approx_recip),
        n_valid=int(n), block_rows=int(block_rows), chunk_rows=int(chunk_rows),
        tiles_per_core=int(tiles_per_core), need_mask=bool(need_mask),
        two_axes=bool(two_axes),
    )

    if two_axes:
        def in_map(p, i):
            b = p * tiles_per_core + i
            if overrun:
                # Clamp duplicated overrun blocks to a valid block; they add 0
                # because their unclamped global indices are >= n (masked).
                b = jnp.minimum(b, num_blocks - 1)
            return (b, 0)
        out_map = lambda p, i: (p, 0)
        grid = (n_cores, tiles_per_core)
        semantics = (pltpu.CORE_PARALLEL, pltpu.ARBITRARY)
    else:
        in_map = lambda i: (i, 0)
        out_map = lambda i: (0, 0)
        grid = (num_blocks,)
        semantics = (pltpu.ARBITRARY,)

    in_spec = pl.BlockSpec((block_rows, _LANES), in_map)
    out_spec = pl.BlockSpec((_SUBLANES, _LANES), out_map)

    return pl.pallas_call(
        kernel,
        out_shape=jax.ShapeDtypeStruct((n_cores * _SUBLANES, _LANES), jnp.float32),
        grid_spec=pltpu.PrefetchScalarGridSpec(
            num_scalar_prefetch=0,
            grid=grid,
            in_specs=[in_spec, in_spec],
            out_specs=out_spec,
        ),
        compiler_params=pltpu.CompilerParams(dimension_semantics=semantics),
    )(x2d, t2d)


def focal_loss(inputs, targets, *, alpha=ALPHA, gamma=GAMMA,
               label_smoothing=LABEL_SMOOTHING, reduction=REDUCTION,
               assume_binary_targets=True, approx_reciprocal=True):
    """Pallas TPU focal loss. inputs/targets: arbitrary matching shape (e.g. NCHW).

    assume_binary_targets: enables the 2-EUP sigmoid-derived pt path (targets
    must be exactly 0/1, as in the demo).  approx_reciprocal: uses the EUP
    vrcp (perturbs pt at ~vrcp precision; set False for bit-tight numerics).
    """
    assert inputs.shape == targets.shape
    n = int(inputs.size)
    assert n > 0
    assert n < 2 ** 31, "in-kernel global-index math is int32"

    # TODO(synk): verify in the HLO that this flatten does not insert an XLA
    # relayout copy for inputs whose native layout pads the trailing dim
    # (e.g. NCHW with W not a multiple of 128); if it does, feed the kernel a
    # 2-D collapse whose last dim is already lane-aligned instead.
    x = inputs.reshape(-1)
    t = targets.reshape(-1)

    # Only pad when n is not a multiple of 8*128 (reshape legality); the tail
    # itself is masked in-kernel, no mask array is ever materialized.
    unit = _SUBLANES * _LANES
    n_pad = int(pl.cdiv(n, unit)) * unit
    if n_pad != n:
        x = jnp.pad(x, (0, n_pad - n))
        t = jnp.pad(t, (0, n_pad - n))
    x = x.reshape(-1, _LANES)
    t = t.reshape(-1, _LANES)
    rows = x.shape[0]                         # multiple of 8

    block_rows = min(_MAX_BLOCK_ROWS, rows)   # multiple of 8 (or 32 when tiled)

    # NOTE: like the PyTorch reference, alpha weighting assumes binary (or
    # smoothed-binary) targets; the fast pt path additionally requires {0,1}.
    binary_fast = bool(assume_binary_targets) and not (label_smoothing > 0)

    run = functools.partial(
        _run_pallas, x, t, n=n, block_rows=block_rows, alpha=alpha, gamma=gamma,
        label_smoothing=label_smoothing, binary_fast=binary_fast,
        approx_recip=approx_reciprocal)

    n_cores = _num_tensorcores()
    if n_cores >= 2:
        try:
            partials = run(n_cores=n_cores)       # real per-core split (v7x)
        except Exception:
            partials = run(n_cores=1)             # CORE_PARALLEL unsupported here
    else:
        partials = run(n_cores=1)                 # 1-TC chips: no useless split

    total = jnp.sum(partials)
    if reduction == "mean":
        return total / jnp.float32(n)
    return total


def _focal_loss_ref(inputs, targets, *, alpha=ALPHA, gamma=GAMMA,
                    label_smoothing=LABEL_SMOOTHING, reduction=REDUCTION):
    """Pure-JAX reference mirroring the PyTorch forward."""
    x = inputs.astype(jnp.float32)
    t = targets.astype(jnp.float32)
    if label_smoothing > 0:
        pos_smooth = 1.0 - label_smoothing / 2.0
        neg_smooth = label_smoothing / 2.0
        t = jnp.where(t > 0.5, pos_smooth, neg_smooth)
    else:
        neg_smooth = 0.0
    bce = jnp.maximum(x, 0.0) - x * t + jnp.log1p(jnp.exp(-jnp.abs(x)))
    pt = jnp.exp(-bce)
    aw = jnp.where(t > neg_smooth, alpha, 1.0 - alpha)
    fl = aw * (1.0 - pt) ** gamma * bce
    return jnp.mean(fl) if reduction == "mean" else jnp.sum(fl)


if __name__ == "__main__":
    key = jax.random.PRNGKey(0)
    k1, k2, k3, k4, k5, k6 = jax.random.split(key, 6)

    # NCHW logits; binary targets shipped as int8 (1 byte/elem of HBM traffic),
    # cast to f32 inside the kernel — compute stays f32 on all chip gens.
    B, C, H, W = 2, 4, 16, 16
    logits = jax.random.normal(k1, (B, C, H, W), dtype=jnp.float32)
    targets = (jax.random.uniform(k2, (B, C, H, W)) > 0.5).astype(jnp.int8)

    ref = _focal_loss_ref(logits, targets)

    # Default fast path uses the approximate EUP reciprocal for pt, so the
    # tolerance is relaxed (documented perturbation at ~vrcp precision).
    loss = jax.block_until_ready(focal_loss(logits, targets))
    assert jnp.allclose(loss, ref, rtol=1e-2, atol=1e-4), (loss, ref)

    # Exact-reciprocal path matches the reference tightly.
    loss_exact = jax.block_until_ready(
        focal_loss(logits, targets, approx_reciprocal=False))
    assert jnp.allclose(loss_exact, ref, rtol=1e-5, atol=1e-6), (loss_exact, ref)

    # Ragged shape: exercises padding + the in-kernel tail mask (no mask array).
    logits2 = jax.random.normal(k3, (2, 3, 5, 7), dtype=jnp.float32)
    targets2 = (jax.random.uniform(k4, (2, 3, 5, 7)) > 0.5).astype(jnp.int8)
    loss2 = jax.block_until_ready(focal_loss(logits2, targets2))
    ref2 = _focal_loss_ref(logits2, targets2)
    assert jnp.allclose(loss2, ref2, rtol=1e-2, atol=1e-4), (loss2, ref2)

    # Larger shape: exercises multi-block grid, the in-kernel 512-row chunk
    # loop, the gated tail mask (last block only) and the partial-block DMA.
    logits3 = jax.random.normal(k5, (2, 4, 300, 300), dtype=jnp.float32)
    targets3 = (jax.random.uniform(k6, (2, 4, 300, 300)) > 0.5).astype(jnp.int8)
    loss3 = jax.block_until_ready(focal_loss(logits3, targets3))
    ref3 = _focal_loss_ref(logits3, targets3)
    assert jnp.allclose(loss3, ref3, rtol=1e-2, atol=1e-4), (loss3, ref3)

    print("KERNEL_OK")
</pallas_src>

<mosaic_0001>
module attributes {stable_mosaic.version = 11 : i64} {
  func.func @_focal_loss_kernel(%arg0: i32, %arg1: memref<16x128xf32, #tpu.memory_space<vmem>>, %arg2: memref<16x128xi8, #tpu.memory_space<vmem>>, %arg3: memref<8x128xf32, #tpu.memory_space<vmem>>) attributes {dimension_semantics = [#tpu.dimension_semantics<arbitrary>], iteration_bounds = array<i64: 1>, scalar_prefetch = 0 : i64, scratch_operands = 0 : i64, tpu.core_type = #tpu.core_type<tc>, window_params = [{transform_indices = @transform_0, window_bounds = array<i64: 16, 128>}, {transform_indices = @transform_1, window_bounds = array<i64: 16, 128>}, {pipeline_mode = #tpu.pipeline_mode<synchronous>, transform_indices = @transform_2, window_bounds = array<i64: 8, 128>}]} {
    %c0_i32 = arith.constant 0 : i32
    %0 = arith.cmpi eq, %arg0, %c0_i32 : i32
    %1 = arith.extui %0 : i1 to i32
    %c0_i32_0 = arith.constant 0 : i32
    %2 = arith.cmpi ne, %1, %c0_i32_0 : i32
    scf.if %2 {
      %cst_17 = arith.constant 0.000000e+00 : f32
      %41 = vector.broadcast %cst_17 : f32 to vector<8x128xf32>
      %c0_18 = arith.constant 0 : index
      %c0_19 = arith.constant 0 : index
      %42 = vector.load %arg3[%c0_18, %c0_19] : memref<8x128xf32, #tpu.memory_space<vmem>>, vector<8x128xf32>
      tpu.vector_store %arg3[%c0_18, %c0_19], %41 {strides = array<i32>} : memref<8x128xf32, #tpu.memory_space<vmem>>, vector<8x128xf32>,
    } else {
    }
    %c0 = arith.constant 0 : index
    %c0_1 = arith.constant 0 : index
    %3 = vector.load %arg1[%c0, %c0_1] : memref<16x128xf32, #tpu.memory_space<vmem>>, vector<16x128xf32>
    %c0_2 = arith.constant 0 : index
    %c0_3 = arith.constant 0 : index
    %4 = vector.load %arg2[%c0_2, %c0_3] : memref<16x128xi8, #tpu.memory_space<vmem>>, vector<16x128xi8>
    %5 = arith.sitofp %4 : vector<16x128xi8> to vector<16x128xf32>
    %6 = math.absf %3 : vector<16x128xf32>
    %cst = arith.constant 0.000000e+00 : f32
    %7 = vector.broadcast %cst : f32 to vector<16x128xf32>
    %8 = arith.subf %7, %6 : vector<16x128xf32>
    %9 = math.exp %8 : vector<16x128xf32>
    %cst_4 = arith.constant 0.000000e+00 : f32
    %10 = vector.broadcast %cst_4 : f32 to vector<16x128xf32>
    %11 = arith.maximumf %3, %10 : vector<16x128xf32>
    %12 = arith.mulf %3, %5 : vector<16x128xf32>
    %13 = arith.subf %11, %12 : vector<16x128xf32>
    %14 = math.log1p %9 : vector<16x128xf32>
    %15 = arith.addf %13, %14 : vector<16x128xf32>
    %cst_5 = arith.constant 1.000000e+00 : f32
    %16 = vector.broadcast %cst_5 : f32 to vector<16x128xf32>
    %17 = arith.addf %16, %9 : vector<16x128xf32>
    %18 = tpu.reciprocal %17 {approx = true} : vector<16x128xf32> -> vector<16x128xf32>
    %cst_6 = arith.constant 0.000000e+00 : f32
    %19 = vector.broadcast %cst_6 : f32 to vector<16x128xf32>
    %20 = arith.cmpf olt, %3, %19 : vector<16x128xf32>
    %cst_7 = arith.constant 5.000000e-01 : f32
    %21 = vector.broadcast %cst_7 : f32 to vector<16x128xf32>
    %22 = arith.cmpf ogt, %5, %21 : vector<16x128xf32>
    %23 = arith.xori %20, %22 : vector<16x128xi1>
    %24 = arith.mulf %9, %18 : vector<16x128xf32>
    %25 = arith.select %23, %18, %24 : vector<16x128xi1>, vector<16x128xf32>
    %cst_8 = arith.constant 0.000000e+00 : f32
    %26 = vector.broadcast %cst_8 : f32 to vector<16x128xf32>
    %27 = arith.cmpf ogt, %5, %26 : vector<16x128xf32>
    %cst_9 = arith.constant 2.500000e-01 : f32
    %cst_10 = arith.constant 7.500000e-01 : f32
    %28 = vector.broadcast %cst_9 : f32 to vector<16x128xf32>
    %29 = vector.broadcast %cst_10 : f32 to vector<16x128xf32>
    %30 = arith.select %27, %28, %29 : vector<16x128xi1>, vector<16x128xf32>
    %cst_11 = arith.constant 1.000000e+00 : f32
    %31 = vector.broadcast %cst_11 : f32 to vector<16x128xf32>
    %32 = arith.subf %31, %25 : vector<16x128xf32>
    %33 = arith.mulf %32, %32 : vector<16x128xf32>
    %34 = arith.mulf %30, %33 : vector<16x128xf32>
    %35 = arith.mulf %34, %15 : vector<16x128xf32>
    %c0_12 = arith.constant 0 : index
    %c0_13 = arith.constant 0 : index
    %36 = vector.load %arg3[%c0_12, %c0_13] : memref<8x128xf32, #tpu.memory_space<vmem>>, vector<8x128xf32>
    %37 = vector.shape_cast %35 : vector<16x128xf32> to vector<2x8x128xf32>
    %cst_14 = arith.constant dense<0.000000e+00> : vector<8x128xf32>
    %38 = vector.multi_reduction <add>, %37, %cst_14 [0] : vector<2x8x128xf32> to vector<8x128xf32>
    %39 = arith.addf %36, %38 : vector<8x128xf32>
    %c0_15 = arith.constant 0 : index
    %c0_16 = arith.constant 0 : index
    %40 = vector.load %arg3[%c0_15, %c0_16] : memref<8x128xf32, #tpu.memory_space<vmem>>, vector<8x128xf32>
    tpu.vector_store %arg3[%c0_15, %c0_16], %39 {strides = array<i32>} : memref<8x128xf32, #tpu.memory_space<vmem>>, vector<8x128xf32>,
    return
  }
  func.func @transform_0(%arg0: i32) -> (i32, i32) {
    %c0_i32 = arith.constant 0 : i32
    %c0_i32_0 = arith.constant 0 : i32
    return %arg0, %c0_i32 : i32, i32
  }
  func.func @transform_1(%arg0: i32) -> (i32, i32) {
    %c0_i32 = arith.constant 0 : i32
    %c0_i32_0 = arith.constant 0 : i32
    return %arg0, %c0_i32 : i32, i32
  }
  func.func @transform_2(%arg0: i32) -> (i32, i32) {
    %c0_i32 = arith.constant 0 : i32
    %c0_i32_0 = arith.constant 0 : i32
    %c0_i32_1 = arith.constant 0 : i32
    return %c0_i32, %c0_i32_0 : i32, i32
  }
}

</mosaic_0001>

<bundles_post_ra>
// kernel: tpu_custom_call.1
= control target key start
LH: loop header
LB: loop body
LE: loop exit
PB: predicated region body
PF: predicated region fallthrough
CT: control target
= control target key end

     0   :  { %7 = vsyncpa [#allocation3], 0  ;;  %s270_s0 = inlined_call_operand.hbm [shape: f32[16,128], index: 0, kind: input, shape index: {}]   ;;  %s271_s1 = inlined_call_operand.hbm [shape: s8[16,128], index: 1, kind: input, shape index: {}]   ;;  %s272_s2 = inlined_call_operand.hbm [shape: f32[8,128], index: 2, kind: output, shape index: {}]  }
   0x1   :  { %8 = vsyncpa [#allocation6], 0 }
   0x2   :  { %9 = vsyncpa [#allocation4], 0  ;;  %s224_s9 = smov [#allocation2]  }
   0x3   :  { %s15_s10 = sshll.u32 %s224_s9, 4  ;;  %s16_s10 = int_to_ptr.vmem [resolvable:$true] %s15_s10 }
   0x4   :  { %s166_s11 = scalar_lea.vmem %s16_s10, 256  ;;  %p171_p1 = scmp.lt.s32.totalorder %s16_s10, %s16_s10 }
   0x5   :  { %p167_p0 = scmp.ne.s32.totalorder %s16_s10, %s166_s11  ;;  %p172_p2 = scmp.lt.s32.totalorder %s166_s11, %s166_s11 }
   0x7   :  { %p173_p3 = por %p172_p2, %p171_p1 }
   0x9   :  { %p174_p4 = pnand %p173_p3, %p167_p0 }
   0xb   :  { %177 = shalt.err (!%p174_p4)
}
   0xc   :  { %s225_s12 = smov 128   ;;  %s226_s13 = smov 8  }
   0xd   :  { %21 = dma.hbm_to_vmem [thread:$0]  %s270_s0, 256, %s16_s10, [#allocation3], %s225_s12, %s225_s12, %s226_s13  }
   0xe   :  { %s227_s16 = smov [#allocation5]  }
   0xf   :  { %s27_s17 = sshll.u32 %s227_s16, 4  ;;  %s28_s17 = int_to_ptr.vmem [resolvable:$true] %s27_s17 }
  0x10   :  { %s186_s18 = scalar_lea.vmem %s28_s17, 64  ;;  %p191_p6 = scmp.lt.s32.totalorder %s28_s17, %s28_s17 }
  0x11   :  { %p187_p5 = scmp.ne.s32.totalorder %s28_s17, %s186_s18  ;;  %p192_p7 = scmp.lt.s32.totalorder %s186_s18, %s186_s18 }
  0x13   :  { %p193_p8 = por %p192_p7, %p191_p6 }
  0x15   :  { %p194_p9 = pnand %p193_p8, %p187_p5 }
  0x17   :  { %197 = shalt.err (!%p194_p9)
}
  0x18   :  { %s228_s19 = smov 32   ;;  %s229_s20 = smov 2  }
  0x19   :  { %33 = dma.hbm_to_vmem [thread:$0]  %s271_s1, 64, %s28_s17, [#allocation6], %s228_s19, %s228_s19, %s229_s20  }
  0x1a   :  { %218 = dma.done.wait [#allocation3], 256  }
  0x1b   :  { %219 = vsyncadd [#allocation3], 4294967040 }
  0x1c   :  { %220 = dma.done.wait [#allocation6], 64  }
  0x1d   :  { %221 = vsyncadd [#allocation6], 4294967232  ;;  %v45_v0 = vld [vmem:[#allocation2] sm:$0xff]  ;;  %v46_v1 = vld [vmem:[#allocation2 + $0x8] sm:$0xff]  ;;  %v230_v46 = vmov 0.75   ;;  %s231_s0 = smov [#allocation7]  }
  0x1e   :  { %v53_v2 = vand.u32 2147483647, %v45_v0  ;;  %v54_v3 = vand.u32 2147483647, %v46_v1  ;;  %v134_v12 = vld [vmem:[#allocation5] sm:$0xf]  }
  0x1f   :  { %v135_v13 = vunpack.c.0.s8 %v134_v12  ;;  %v136_v14 = vunpack.c.1.s8 %v134_v12  ;;  %vm91_vm0 = vcmp.lt.f32.partialorder %v45_v0, 0.0  ;;  %v61_v24 = vmax.f32 %v45_v0, 0.0  ;;  %s123_s1 = sshll.u32 %s231_s0, 4  ;;  %s124_s1 = int_to_ptr.vmem [resolvable:$true] %s123_s1 }
  0x20   :  { %v55_v4 = vsub.f32 0.0, %v53_v2  ;;  %v56_v5 = vsub.f32 0.0, %v54_v3  ;;  %vm92_vm2 = vcmp.lt.f32.partialorder %v46_v1, 0.0  ;;  %v62_v27 = vmax.f32 %v46_v1, 0.0  ;;  %s198_s23 = scalar_lea.vmem %s124_s1, 128  ;;  %p203_p11 = scmp.lt.s32.totalorder %s124_s1, %s124_s1 }
  0x21   :  { %v51_v17 = vcvt.s32.f32 %v135_v13  ;;  %v52_v18 = vcvt.s32.f32 %v136_v14  ;;  %p199_p10 = scmp.ne.s32.totalorder %s124_s1, %s198_s23  ;;  %p204_p12 = scmp.lt.s32.totalorder %s198_s23, %s198_s23 }
  0x22   :  { %v57_v6 = vmul.f32 1.442695, %v55_v4  ;;  %v59_v7 = vmul.f32 1.442695, %v56_v5 }
  0x23   :  { %vm93_vm1 = vcmp.gt.f32.partialorder %v51_v17, 0.5  ;;  %v63_v25 = vmul.f32 %v51_v17, %v45_v0  ;;  %vm94_vm3 = vcmp.gt.f32.partialorder %v52_v18, 0.5  ;;  %v64_v28 = vmul.f32 %v52_v18, %v46_v1  ;;  %p205_p13 = por %p204_p12, %p203_p11 }
  0x24   :  { %146 = vpow2.f32 %v57_v6  ;;  %vm95_vm5 = vmxor %vm91_vm0, %vm93_vm1  ;;  %vm101_vm8 = vcmp.gt.f32.partialorder %v51_v17, 0.0  ;;  %vm102_vm9 = vcmp.gt.f32.partialorder %v52_v18, 0.0 }
  0x25   :  { %148 = vpow2.f32 %v59_v7  ;;  %vm96_vm7 = vmxor %vm92_vm2, %vm94_vm3  ;;  %v65_v38 = vsub.f32 %v61_v24, %v63_v25  ;;  %v66_v40 = vsub.f32 %v62_v27, %v64_v28  ;;  %v103_v47 = vsel %vm101_vm8, 0.25, %v230_v46  ;;  %p206_p0 = pnand %p205_p13, %p199_p10 }
  0x26   :  { %v104_v50 = vsel %vm102_vm9, 0.25, %v230_v46 }
  0x31   :  { %v147_v8 = vpop.eup %146 }
  0x32   :  { %v149_v9 = vpop.eup %148  ;;  %v67_v10 = vadd.f32 1.0, %v147_v8  ;;  %v70_v15 = vmul.f32 -0.5, %v147_v8  ;;  %v73_v20 = vand.u32 2147483647, %v147_v8 }
  0x33   :  { %v76_v11 = vadd.f32 1.0, %v149_v9  ;;  %v79_v16 = vmul.f32 -0.5, %v149_v9  ;;  %v82_v22 = vand.u32 2147483647, %v149_v9 }
  0x34   :  { %150 = vlog2.f32 %v67_v10  ;;  %v71_v19 = vadd.f32 1.0, %v70_v15  ;;  %vm253_vm4 = vcmp.lt.f32.partialorder %v73_v20, 0.0004427343 }
  0x35   :  { %152 = vlog2.f32 %v76_v11  ;;  %v80_v21 = vadd.f32 1.0, %v79_v16  ;;  %vm259_vm6 = vcmp.lt.f32.partialorder %v82_v22, 0.0004427343 }
  0x36   :  { %154 = vrcp.f32 %v67_v10  ;;  %v72_v30 = vmul.f32 %v147_v8, %v71_v19 }
  0x37   :  { %156 = vrcp.f32 %v76_v11  ;;  %v81_v34 = vmul.f32 %v149_v9, %v80_v21 }
  0x41   :  { %v151_v23 = vpop.eup %150 }
  0x42   :  { %v153_v26 = vpop.eup %152  ;;  %v69_v29 = vmul.f32 0.6931472, %v151_v23 }
  0x43   :  { %v155_v31 = vpop.eup %154  ;;  %v78_v33 = vmul.f32 0.6931472, %v153_v26 }
  0x44   :  { %v157_v35 = vpop.eup %156  ;;  %v97_v37 = vmul.f32 %v155_v31, %v147_v8  ;;  %v75_v41 = vsel %vm253_vm4, %v72_v30, %v69_v29 }
  0x45   :  { %v98_v39 = vmul.f32 %v157_v35, %v149_v9  ;;  %v84_v43 = vsel %vm259_vm6, %v81_v34, %v78_v33  ;;  %v85_v49 = vadd.f32 %v75_v41, %v65_v38 }
  0x46   :  { %v99_v42 = vsel %vm95_vm5, %v155_v31, %v97_v37  ;;  %v86_v52 = vadd.f32 %v84_v43, %v66_v40 }
  0x47   :  { %v100_v44 = vsel %vm96_vm7, %v157_v35, %v98_v39  ;;  %v105_v45 = vsub.f32 1.0, %v99_v42 }
  0x48   :  { %v106_v48 = vsub.f32 1.0, %v100_v44 }
  0x49   :  { %v107_v51 = vmul.f32 %v105_v45, %v105_v45 }
  0x4a   :  { %v108_v53 = vmul.f32 %v106_v48, %v106_v48 }
  0x4b   :  { %v109_v54 = vmul.f32 %v107_v51, %v103_v47 }
  0x4c   :  { %v110_v55 = vmul.f32 %v108_v53, %v104_v50 }
  0x4d   :  { %v111_v56 = vmul.f32 %v109_v54, %v85_v49 }
  0x4e   :  { %v112_v57 = vmul.f32 %v110_v55, %v86_v52 }
  0x50   :  { %v114_v58 = vadd.f32 %v112_v57, %v111_v56 }
  0x52   :  { %116 = vst [vmem:[#allocation7] sm:$0xff] %v114_v58 }
  0x53   :  { %209 = shalt.err (!%p206_p0)
}
  0x54   :  { %126 = dma.vmem_to_hbm [thread:$0]  %s124_s1, 128, %s272_s2, [#allocation4]  }
  0x55   :  { %222 = dma.done.wait [#allocation4], 128  }
  0x56   :  { %223 = vsyncadd [#allocation4], 4294967168 }
  0x57   :  { %130 = vsyncpa [#allocation3], 1 }
  0x58   :  { %131 = vsyncpa [#allocation6], 1 }
  0x59   :  { %132 = vsyncpa [#allocation4], 1 }

</bundles_post_ra>
